<compile_context>
chip_gen: v7x
topology: tpu7x:2x2x1
jax: 0.10.0
libtpu: 0.0.40
codegen_flags: <defaults>
</compile_context>

<pallas_src>
import math
import numpy as np
import jax
import jax.numpy as jnp
from jax import lax
from jax.experimental import pallas as pl
from jax.experimental.pallas import tpu as pltpu

# ----- module-consistent shapes -----
B, S, H = 2, 8, 32
NUM_HEADS = 4
HEAD_DIM = H // NUM_HEADS
INTER = 64
BS = B * S                      # 16 rows after folding batch into the matmul M dim
NHS = NUM_HEADS * S             # 32
BHS = B * NHS                   # 64 block-diagonal attention columns
EPS = 1e-5
SCALING = HEAD_DIM ** -0.5
GELU_C = math.sqrt(2.0 / math.pi)

assert INTER == 2 * H == BHS    # packed-slab widths below rely on this

# packed f32 slab `vecs` [VECS_ROWS, INTER] row layout
ROW_LN1G, ROW_LN1B, ROW_LN2G, ROW_LN2B, ROW_B1, ROW_B2 = 0, 1, 2, 3, 4, 5
ROW_MASK = 8                    # rows  8:24  additive block-diagonal mask [BS, BHS]
ROW_COS = 24                    # rows 24:40  RoPE cos over q|k lanes      [BS, 2H]
ROW_SIN = 40                    # rows 40:56  RoPE sin (sign folded)       [BS, 2H]
VECS_ROWS = 56


def _layer_norm(h, g, b):
    mu = jnp.mean(h, axis=-1, keepdims=True)
    var = jnp.mean((h - mu) ** 2, axis=-1, keepdims=True)
    return (h - mu) * lax.rsqrt(var + EPS) * g + b


def msingi_block_kernel(x_ref, wqkv_ref, wqkr_ref, wo_ref, w1_ref, w2_ref,
                        emask_ref, vecs_ref, o_ref):
    f32, bf16 = jnp.float32, jnp.bfloat16

    x = x_ref[...]                                            # [BS, H] f32

    ln1_g = vecs_ref[ROW_LN1G:ROW_LN1G + 1, 0:H]
    ln1_b = vecs_ref[ROW_LN1B:ROW_LN1B + 1, 0:H]
    ln2_g = vecs_ref[ROW_LN2G:ROW_LN2G + 1, 0:H]
    ln2_b = vecs_ref[ROW_LN2B:ROW_LN2B + 1, 0:H]
    b1 = vecs_ref[ROW_B1:ROW_B1 + 1, :]                       # [1, INTER]
    b2 = vecs_ref[ROW_B2:ROW_B2 + 1, 0:H]                     # [1, H]
    bd_add = vecs_ref[ROW_MASK:ROW_MASK + BS, :]              # [BS, BHS] additive mask (0 / -1e9)
    cos2 = vecs_ref[ROW_COS:ROW_COS + BS, :]                  # [BS, 2H]
    sin2 = vecs_ref[ROW_SIN:ROW_SIN + BS, :]                  # [BS, 2H] (sign-adjusted)

    expand = emask_ref[:, 0:BS]                               # bf16 [BHS, BS] row-selector
    hm_b = emask_ref[:, BS:BS + H]                            # bf16 [BHS, H] head-dim mask
    hm = hm_b.astype(f32)

    # ---------------- LN1 + fused QKV / rotated-QK projections ----------------
    # Both matmuls depend only on h1 -> back-to-back MXU pushes (no serial rot3 chain).
    h1 = _layer_norm(x, ln1_g, ln1_b)
    h1b = h1.astype(bf16)
    qkv = jnp.dot(h1b, wqkv_ref[...], preferred_element_type=f32)     # [BS, 3H]
    qk_rot = jnp.dot(h1b, wqkr_ref[...], preferred_element_type=f32)  # [BS, 2H] (pair-swapped q|k)

    # ---------------- RoPE on q|k only (v untouched); f32 elementwise ----------------
    qk = qkv[:, 0:2 * H] * cos2 + qk_rot * sin2
    q = (qk[:, 0:H] * SCALING).astype(bf16)                   # fold softmax scaling into q once
    k_rot = qk[:, H:2 * H].astype(bf16)
    v_raw = qkv[:, 2 * H:3 * H].astype(bf16)

    # ---------------- block-diagonal attention over all (batch, head) pairs ----------------
    kbd = jnp.dot(expand, k_rot, preferred_element_type=f32) * hm     # [BHS, H]
    vbd = jnp.dot(expand, v_raw, preferred_element_type=f32) * hm     # [BHS, H]

    scores = lax.dot_general(q, kbd.astype(bf16), (((1,), (1,)), ((), ())),
                             preferred_element_type=f32) + bd_add     # [BS, BHS]
    # TODO(synk): per-row max is shared across heads; a per-head max would be more robust for real
    # checkpoints. The denom clamp below prevents inf/NaN if one head's exps underflow.
    scores = scores - jnp.max(scores, axis=-1, keepdims=True)
    p = jnp.exp(scores)                                               # f32; masked cols underflow to 0
    p_b = p.astype(bf16)
    denom = jnp.dot(p_b, hm_b, preferred_element_type=f32)            # per-head softmax sums [BS, H]
    denom = jnp.maximum(denom, 1e-30)
    attn = jnp.dot(p_b, vbd.astype(bf16), preferred_element_type=f32) / denom
    # TODO(synk): attention / hidden dropout omitted (identity in eval mode)

    attn = jnp.dot(attn.astype(bf16), wo_ref[...], preferred_element_type=f32)
    x = x + attn                                              # first residual

    # ---------------- LN2 + MLP (GELU tanh); elementwise in f32 ----------------
    h2 = _layer_norm(x, ln2_g, ln2_b)
    m = jnp.dot(h2.astype(bf16), w1_ref[...], preferred_element_type=f32) + b1
    m = 0.5 * m * (1.0 + jnp.tanh(GELU_C * (m + 0.044715 * m * m * m)))
    m = jnp.dot(m.astype(bf16), w2_ref[...], preferred_element_type=f32) + b2
    o_ref[...] = x + m                                        # second residual


@jax.jit
def msingi_block(x, wqkv, wqkr, wo, w1, w2, emask, vecs):
    x2d = x.reshape(BS, H)
    vmem = pl.BlockSpec(memory_space=pltpu.MemorySpace.VMEM)
    out = pl.pallas_call(
        msingi_block_kernel,
        out_shape=jax.ShapeDtypeStruct((BS, H), jnp.float32),
        in_specs=[vmem] * 8,
        out_specs=vmem,
        input_output_aliases={0: 0},
    )(x2d, wqkv, wqkr, wo, w1, w2, emask, vecs)
    return out.reshape(B, S, H)


# ---------------- plain-JAX reference (mirrors the PyTorch forward) ----------------
def reference_forward(x, mask, cos_half, sin_half, params):
    def ln(h, g, b):
        mu = h.mean(-1, keepdims=True)
        var = ((h - mu) ** 2).mean(-1, keepdims=True)
        return (h - mu) / jnp.sqrt(var + EPS) * g + b

    h1 = ln(x, params["ln1_g"], params["ln1_b"])
    q = (h1 @ params["wq"]).reshape(B, S, NUM_HEADS, HEAD_DIM)
    k = (h1 @ params["wk"]).reshape(B, S, NUM_HEADS, HEAD_DIM)
    v = (h1 @ params["wv"]).reshape(B, S, NUM_HEADS, HEAD_DIM)

    def rope(t):
        tr = t.reshape(B, S, NUM_HEADS, HEAD_DIM // 2, 2)
        te, to = tr[..., 0], tr[..., 1]
        c = cos_half[None, :, None, :]
        s = sin_half[None, :, None, :]
        oe = te * c - to * s
        oo = te * s + to * c
        return jnp.stack([oe, oo], axis=-1).reshape(B, S, NUM_HEADS, HEAD_DIM)

    q, k = rope(q), rope(k)
    q = q.transpose(0, 2, 1, 3)
    k = k.transpose(0, 2, 1, 3)
    v = v.transpose(0, 2, 1, 3)
    s = jnp.einsum("bhqd,bhkd->bhqk", q, k) * SCALING + mask[None, None]
    p = jax.nn.softmax(s, axis=-1)
    o = jnp.einsum("bhqk,bhkd->bhqd", p, v)
    o = o.transpose(0, 2, 1, 3).reshape(B, S, H)
    o = o @ params["wo"]
    x = x + o
    h2 = ln(x, params["ln2_g"], params["ln2_b"])
    m = h2 @ params["w1"] + params["b1"]
    m = 0.5 * m * (1.0 + jnp.tanh(GELU_C * (m + 0.044715 * m ** 3)))
    m = m @ params["w2"] + params["b2"]
    return x + m


if __name__ == "__main__":
    key = jax.random.PRNGKey(0)
    ks = jax.random.split(key, 12)

    x = jax.random.normal(ks[0], (B, S, H), dtype=jnp.float32)

    # parameters (deterministic synthetic init; Linear weights stored as [in, out])
    params = {
        "wq": 0.02 * jax.random.normal(ks[1], (H, H), jnp.float32),
        "wk": 0.02 * jax.random.normal(ks[2], (H, H), jnp.float32),
        "wv": 0.02 * jax.random.normal(ks[3], (H, H), jnp.float32),
        "wo": 0.02 * jax.random.normal(ks[4], (H, H), jnp.float32),
        "ln1_g": jnp.ones((1, H), jnp.float32) + 0.1 * jax.random.normal(ks[5], (1, H)),
        "ln1_b": 0.1 * jax.random.normal(ks[6], (1, H), jnp.float32),
        "ln2_g": jnp.ones((1, H), jnp.float32) + 0.1 * jax.random.normal(ks[7], (1, H)),
        "ln2_b": 0.1 * jax.random.normal(ks[8], (1, H), jnp.float32),
        "w1": 0.02 * jax.random.normal(ks[9], (H, INTER), jnp.float32),
        "b1": 0.02 * jax.random.normal(ks[10], (1, INTER), jnp.float32),
        "w2": 0.02 * jax.random.normal(ks[11], (INTER, H), jnp.float32),
        "b2": jnp.zeros((1, H), jnp.float32),
    }

    # ---- rotary frequencies (freqs_cis), precomputed as cos/sin ----
    inv_freq = 1.0 / (10000.0 ** (np.arange(0, HEAD_DIM, 2, dtype=np.float32) / HEAD_DIM))
    angles = np.arange(S, dtype=np.float32)[:, None] * inv_freq[None, :]     # [S, HEAD_DIM//2]
    cos_half_np, sin_half_np = np.cos(angles), np.sin(angles)

    # ---- packed kernel inputs ----
    # fused qkv weight [H, 3H] and rotation-folded q|k weight [H, 2H], both bf16 MXU operands
    r_head = np.zeros((HEAD_DIM, HEAD_DIM), np.float32)
    idx = np.arange(0, HEAD_DIM, 2)
    r_head[idx + 1, idx] = 1.0
    r_head[idx, idx + 1] = 1.0
    rot_qk = jnp.asarray(np.kron(np.eye(NUM_HEADS, dtype=np.float32), r_head))  # [H, H] pair-swap
    wqkv = jnp.concatenate([params["wq"], params["wk"], params["wv"]], axis=1).astype(jnp.bfloat16)
    wqkr = jnp.concatenate([params["wq"] @ rot_qk, params["wk"] @ rot_qk], axis=1).astype(jnp.bfloat16)
    wo_b = params["wo"].astype(jnp.bfloat16)
    w1_b = params["w1"].astype(jnp.bfloat16)
    w2_b = params["w2"].astype(jnp.bfloat16)

    # block-diagonal expansion constants (trace-time numpy, not rebuilt in-kernel)
    c = np.arange(BHS)
    b_of_c, h_of_c, j_of_c = c // NHS, (c // S) % NUM_HEADS, c % S
    r = np.arange(BS)
    expand_np = (r[None, :] == (b_of_c * S + j_of_c)[:, None]).astype(np.float32)    # [BHS, BS]
    d = np.arange(H)
    head_mask_np = (h_of_c[:, None] == (d[None, :] // HEAD_DIM)).astype(np.float32)  # [BHS, H]
    emask = jnp.asarray(np.concatenate([expand_np, head_mask_np], axis=1), jnp.bfloat16)  # [64, 48]

    i = np.arange(BS)
    allowed = ((i[:, None] // S) == b_of_c[None, :]) & (j_of_c[None, :] <= (i[:, None] % S))
    bd_add_np = np.where(allowed, 0.0, -1e9).astype(np.float32)                       # [BS, BHS]

    # cos/sin over q|k lanes only (v third dropped), tiled over heads and batch
    cos_head = np.tile(np.repeat(cos_half_np, 2, axis=-1), (1, NUM_HEADS))            # [S, H]
    sign = np.tile(np.array([-1.0, 1.0], np.float32), HEAD_DIM // 2)
    sin_head = np.tile(np.repeat(sin_half_np, 2, axis=-1) * sign[None, :], (1, NUM_HEADS))
    cos2_np = np.tile(np.concatenate([cos_head, cos_head], axis=1), (B, 1))           # [BS, 2H]
    sin2_np = np.tile(np.concatenate([sin_head, sin_head], axis=1), (B, 1))           # [BS, 2H]

    # all small f32 vectors + masks + cos/sin packed into one [56, INTER] slab
    vecs_np = np.zeros((VECS_ROWS, INTER), np.float32)
    vecs_np[ROW_LN1G, :H] = np.asarray(params["ln1_g"][0])
    vecs_np[ROW_LN1B, :H] = np.asarray(params["ln1_b"][0])
    vecs_np[ROW_LN2G, :H] = np.asarray(params["ln2_g"][0])
    vecs_np[ROW_LN2B, :H] = np.asarray(params["ln2_b"][0])
    vecs_np[ROW_B1, :] = np.asarray(params["b1"][0])
    vecs_np[ROW_B2, :H] = np.asarray(params["b2"][0])
    vecs_np[ROW_MASK:ROW_MASK + BS, :] = bd_add_np
    vecs_np[ROW_COS:ROW_COS + BS, :] = cos2_np
    vecs_np[ROW_SIN:ROW_SIN + BS, :] = sin2_np
    vecs = jnp.asarray(vecs_np)

    # ---- reference (per-batch causal additive mask, as in the PyTorch module usage) ----
    causal = jnp.tril(jnp.ones((S, S), dtype=bool))
    mask = jnp.where(causal, 0.0, -1e9).astype(jnp.float32)
    ref = reference_forward(x, mask, jnp.asarray(cos_half_np), jnp.asarray(sin_half_np), params)

    out = msingi_block(x, wqkv, wqkr, wo_b, w1_b, w2_b, emask, vecs)
    out = jax.block_until_ready(out)

    assert out.shape == (B, S, H)
    assert jnp.allclose(out, ref, atol=2e-3, rtol=2e-3), "mismatch vs JAX reference"

    print("KERNEL_OK")
</pallas_src>

<mosaic_0001>
module attributes {stable_mosaic.version = 11 : i64} {
  func.func @msingi_block_kernel(%arg0: memref<16x32xf32, #tpu.memory_space<vmem>>, %arg1: memref<32x96xbf16, #tpu.memory_space<vmem>>, %arg2: memref<32x64xbf16, #tpu.memory_space<vmem>>, %arg3: memref<32x32xbf16, #tpu.memory_space<vmem>>, %arg4: memref<32x64xbf16, #tpu.memory_space<vmem>>, %arg5: memref<64x32xbf16, #tpu.memory_space<vmem>>, %arg6: memref<64x48xbf16, #tpu.memory_space<vmem>>, %arg7: memref<56x64xf32, #tpu.memory_space<vmem>>, %arg8: memref<16x32xf32, #tpu.memory_space<vmem>>) attributes {dimension_semantics = [], scalar_prefetch = 0 : i64, scratch_operands = 0 : i64, tpu.core_type = #tpu.core_type<tc>} {
    %c0 = arith.constant 0 : index
    %c0_0 = arith.constant 0 : index
    %0 = vector.load %arg0[%c0, %c0_0] : memref<16x32xf32, #tpu.memory_space<vmem>>, vector<16x32xf32>
    %c0_1 = arith.constant 0 : index
    %c0_2 = arith.constant 0 : index
    %1 = vector.load %arg7[%c0_1, %c0_2] : memref<56x64xf32, #tpu.memory_space<vmem>>, vector<1x32xf32>
    %c1 = arith.constant 1 : index
    %c0_3 = arith.constant 0 : index
    %2 = vector.load %arg7[%c1, %c0_3] : memref<56x64xf32, #tpu.memory_space<vmem>>, vector<1x32xf32>
    %c2 = arith.constant 2 : index
    %c0_4 = arith.constant 0 : index
    %3 = vector.load %arg7[%c2, %c0_4] : memref<56x64xf32, #tpu.memory_space<vmem>>, vector<1x32xf32>
    %c3 = arith.constant 3 : index
    %c0_5 = arith.constant 0 : index
    %4 = vector.load %arg7[%c3, %c0_5] : memref<56x64xf32, #tpu.memory_space<vmem>>, vector<1x32xf32>
    %c4 = arith.constant 4 : index
    %c0_6 = arith.constant 0 : index
    %5 = vector.load %arg7[%c4, %c0_6] : memref<56x64xf32, #tpu.memory_space<vmem>>, vector<1x64xf32>
    %c5 = arith.constant 5 : index
    %c0_7 = arith.constant 0 : index
    %6 = vector.load %arg7[%c5, %c0_7] : memref<56x64xf32, #tpu.memory_space<vmem>>, vector<1x32xf32>
    %c8 = arith.constant 8 : index
    %c0_8 = arith.constant 0 : index
    %7 = vector.load %arg7[%c8, %c0_8] : memref<56x64xf32, #tpu.memory_space<vmem>>, vector<16x64xf32>
    %c24 = arith.constant 24 : index
    %c0_9 = arith.constant 0 : index
    %8 = vector.load %arg7[%c24, %c0_9] : memref<56x64xf32, #tpu.memory_space<vmem>>, vector<16x64xf32>
    %c40 = arith.constant 40 : index
    %c0_10 = arith.constant 0 : index
    %9 = vector.load %arg7[%c40, %c0_10] : memref<56x64xf32, #tpu.memory_space<vmem>>, vector<16x64xf32>
    %c0_11 = arith.constant 0 : index
    %c0_12 = arith.constant 0 : index
    %10 = vector.load %arg6[%c0_11, %c0_12] : memref<64x48xbf16, #tpu.memory_space<vmem>>, vector<64x16xbf16>
    %c0_13 = arith.constant 0 : index
    %c16 = arith.constant 16 : index
    %11 = vector.load %arg6[%c0_13, %c16] : memref<64x48xbf16, #tpu.memory_space<vmem>>, vector<64x32xbf16>
    %12 = arith.extf %11 : vector<64x32xbf16> to vector<64x32xf32>
    %cst = arith.constant dense<0.000000e+00> : vector<16xf32>
    %13 = vector.multi_reduction <add>, %0, %cst [1] : vector<16x32xf32> to vector<16xf32>
    %14 = vector.shape_cast %13 : vector<16xf32> to vector<16x1xf32>
    %cst_14 = arith.constant 3.200000e+01 : f32
    %15 = vector.broadcast %cst_14 : f32 to vector<16x1xf32>
    %16 = arith.divf %14, %15 : vector<16x1xf32>
    %17 = vector.broadcast %16 : vector<16x1xf32> to vector<16x32xf32>
    %18 = arith.subf %0, %17 : vector<16x32xf32>
    %19 = arith.mulf %18, %18 : vector<16x32xf32>
    %cst_15 = arith.constant dense<0.000000e+00> : vector<16xf32>
    %20 = vector.multi_reduction <add>, %19, %cst_15 [1] : vector<16x32xf32> to vector<16xf32>
    %21 = vector.shape_cast %20 : vector<16xf32> to vector<16x1xf32>
    %cst_16 = arith.constant 3.200000e+01 : f32
    %22 = vector.broadcast %cst_16 : f32 to vector<16x1xf32>
    %23 = arith.divf %21, %22 : vector<16x1xf32>
    %24 = vector.broadcast %16 : vector<16x1xf32> to vector<16x32xf32>
    %25 = arith.subf %0, %24 : vector<16x32xf32>
    %cst_17 = arith.constant 9.99999974E-6 : f32
    %26 = vector.broadcast %cst_17 : f32 to vector<16x1xf32>
    %27 = arith.addf %23, %26 : vector<16x1xf32>
    %28 = math.rsqrt %27 : vector<16x1xf32>
    %29 = vector.broadcast %28 : vector<16x1xf32> to vector<16x32xf32>
    %30 = arith.mulf %25, %29 : vector<16x32xf32>
    %31 = vector.broadcast %1 : vector<1x32xf32> to vector<16x32xf32>
    %32 = arith.mulf %30, %31 : vector<16x32xf32>
    %33 = vector.broadcast %2 : vector<1x32xf32> to vector<16x32xf32>
    %34 = arith.addf %32, %33 : vector<16x32xf32>
    %35 = arith.truncf %34 : vector<16x32xf32> to vector<16x32xbf16>
    %c0_18 = arith.constant 0 : index
    %c0_19 = arith.constant 0 : index
    %36 = vector.load %arg1[%c0_18, %c0_19] : memref<32x96xbf16, #tpu.memory_space<vmem>>, vector<32x96xbf16>
    %cst_20 = arith.constant dense<0.000000e+00> : vector<16x96xf32>
    %37 = tpu.matmul %35, %36, %cst_20 {dimension_numbers = #tpu.dot_dimension_numbers<[1], [0], [0], [1], [0, 0, 1, 1], [], []>} : vector<16x32xbf16>, vector<32x96xbf16>, vector<16x96xf32> -> vector<16x96xf32>
    %c0_21 = arith.constant 0 : index
    %c0_22 = arith.constant 0 : index
    %38 = vector.load %arg2[%c0_21, %c0_22] : memref<32x64xbf16, #tpu.memory_space<vmem>>, vector<32x64xbf16>
    %cst_23 = arith.constant dense<0.000000e+00> : vector<16x64xf32>
    %39 = tpu.matmul %35, %38, %cst_23 {dimension_numbers = #tpu.dot_dimension_numbers<[1], [0], [0], [1], [0, 0, 1, 1], [], []>} : vector<16x32xbf16>, vector<32x64xbf16>, vector<16x64xf32> -> vector<16x64xf32>
    %40 = vector.extract_strided_slice %37 {offsets = [0, 0], sizes = [16, 64], strides = [1, 1]} : vector<16x96xf32> to vector<16x64xf32>
    %41 = arith.mulf %40, %8 : vector<16x64xf32>
    %42 = arith.mulf %39, %9 : vector<16x64xf32>
    %43 = arith.addf %41, %42 : vector<16x64xf32>
    %44 = vector.extract_strided_slice %43 {offsets = [0, 0], sizes = [16, 32], strides = [1, 1]} : vector<16x64xf32> to vector<16x32xf32>
    %cst_24 = arith.constant 0.353553385 : f32
    %45 = vector.broadcast %cst_24 : f32 to vector<16x32xf32>
    %46 = arith.mulf %44, %45 : vector<16x32xf32>
    %47 = arith.truncf %46 : vector<16x32xf32> to vector<16x32xbf16>
    %48 = vector.extract_strided_slice %43 {offsets = [0, 32], sizes = [16, 32], strides = [1, 1]} : vector<16x64xf32> to vector<16x32xf32>
    %49 = arith.truncf %48 : vector<16x32xf32> to vector<16x32xbf16>
    %50 = vector.extract_strided_slice %37 {offsets = [0, 64], sizes = [16, 32], strides = [1, 1]} : vector<16x96xf32> to vector<16x32xf32>
    %51 = arith.truncf %50 : vector<16x32xf32> to vector<16x32xbf16>
    %cst_25 = arith.constant dense<0.000000e+00> : vector<64x32xf32>
    %52 = tpu.matmul %10, %49, %cst_25 {dimension_numbers = #tpu.dot_dimension_numbers<[1], [0], [0], [1], [0, 0, 1, 1], [], []>} : vector<64x16xbf16>, vector<16x32xbf16>, vector<64x32xf32> -> vector<64x32xf32>
    %53 = arith.mulf %52, %12 : vector<64x32xf32>
    %cst_26 = arith.constant dense<0.000000e+00> : vector<64x32xf32>
    %54 = tpu.matmul %10, %51, %cst_26 {dimension_numbers = #tpu.dot_dimension_numbers<[1], [0], [0], [1], [0, 0, 1, 1], [], []>} : vector<64x16xbf16>, vector<16x32xbf16>, vector<64x32xf32> -> vector<64x32xf32>
    %55 = arith.mulf %54, %12 : vector<64x32xf32>
    %56 = arith.truncf %53 : vector<64x32xf32> to vector<64x32xbf16>
    %cst_27 = arith.constant dense<0.000000e+00> : vector<16x64xf32>
    %57 = tpu.matmul %47, %56, %cst_27 {dimension_numbers = #tpu.dot_dimension_numbers<[1], [1], [0], [0], [0, 0, 1, 0], [], []>} : vector<16x32xbf16>, vector<64x32xbf16>, vector<16x64xf32> -> vector<16x64xf32>
    %58 = arith.addf %57, %7 : vector<16x64xf32>
    %cst_28 = arith.constant dense<0xFF800000> : vector<16xf32>
    %59 = vector.multi_reduction <maximumf>, %58, %cst_28 [1] : vector<16x64xf32> to vector<16xf32>
    %60 = vector.shape_cast %59 : vector<16xf32> to vector<16x1xf32>
    %61 = vector.broadcast %60 : vector<16x1xf32> to vector<16x64xf32>
    %62 = arith.subf %58, %61 : vector<16x64xf32>
    %63 = math.exp %62 : vector<16x64xf32>
    %64 = arith.truncf %63 : vector<16x64xf32> to vector<16x64xbf16>
    %cst_29 = arith.constant dense<0.000000e+00> : vector<16x32xf32>
    %65 = tpu.matmul %64, %11, %cst_29 {dimension_numbers = #tpu.dot_dimension_numbers<[1], [0], [0], [1], [0, 0, 1, 1], [], []>} : vector<16x64xbf16>, vector<64x32xbf16>, vector<16x32xf32> -> vector<16x32xf32>
    %cst_30 = arith.constant 1.000000e-30 : f32
    %66 = vector.broadcast %cst_30 : f32 to vector<16x32xf32>
    %67 = arith.maximumf %65, %66 : vector<16x32xf32>
    %68 = arith.truncf %55 : vector<64x32xf32> to vector<64x32xbf16>
    %cst_31 = arith.constant dense<0.000000e+00> : vector<16x32xf32>
    %69 = tpu.matmul %64, %68, %cst_31 {dimension_numbers = #tpu.dot_dimension_numbers<[1], [0], [0], [1], [0, 0, 1, 1], [], []>} : vector<16x64xbf16>, vector<64x32xbf16>, vector<16x32xf32> -> vector<16x32xf32>
    %70 = arith.divf %69, %67 : vector<16x32xf32>
    %71 = arith.truncf %70 : vector<16x32xf32> to vector<16x32xbf16>
    %c0_32 = arith.constant 0 : index
    %c0_33 = arith.constant 0 : index
    %72 = vector.load %arg3[%c0_32, %c0_33] : memref<32x32xbf16, #tpu.memory_space<vmem>>, vector<32x32xbf16>
    %cst_34 = arith.constant dense<0.000000e+00> : vector<16x32xf32>
    %73 = tpu.matmul %71, %72, %cst_34 {dimension_numbers = #tpu.dot_dimension_numbers<[1], [0], [0], [1], [0, 0, 1, 1], [], []>} : vector<16x32xbf16>, vector<32x32xbf16>, vector<16x32xf32> -> vector<16x32xf32>
    %74 = arith.addf %0, %73 : vector<16x32xf32>
    %cst_35 = arith.constant dense<0.000000e+00> : vector<16xf32>
    %75 = vector.multi_reduction <add>, %74, %cst_35 [1] : vector<16x32xf32> to vector<16xf32>
    %76 = vector.shape_cast %75 : vector<16xf32> to vector<16x1xf32>
    %cst_36 = arith.constant 3.200000e+01 : f32
    %77 = vector.broadcast %cst_36 : f32 to vector<16x1xf32>
    %78 = arith.divf %76, %77 : vector<16x1xf32>
    %79 = vector.broadcast %78 : vector<16x1xf32> to vector<16x32xf32>
    %80 = arith.subf %74, %79 : vector<16x32xf32>
    %81 = arith.mulf %80, %80 : vector<16x32xf32>
    %cst_37 = arith.constant dense<0.000000e+00> : vector<16xf32>
    %82 = vector.multi_reduction <add>, %81, %cst_37 [1] : vector<16x32xf32> to vector<16xf32>
    %83 = vector.shape_cast %82 : vector<16xf32> to vector<16x1xf32>
    %cst_38 = arith.constant 3.200000e+01 : f32
    %84 = vector.broadcast %cst_38 : f32 to vector<16x1xf32>
    %85 = arith.divf %83, %84 : vector<16x1xf32>
    %86 = vector.broadcast %78 : vector<16x1xf32> to vector<16x32xf32>
    %87 = arith.subf %74, %86 : vector<16x32xf32>
    %cst_39 = arith.constant 9.99999974E-6 : f32
    %88 = vector.broadcast %cst_39 : f32 to vector<16x1xf32>
    %89 = arith.addf %85, %88 : vector<16x1xf32>
    %90 = math.rsqrt %89 : vector<16x1xf32>
    %91 = vector.broadcast %90 : vector<16x1xf32> to vector<16x32xf32>
    %92 = arith.mulf %87, %91 : vector<16x32xf32>
    %93 = vector.broadcast %3 : vector<1x32xf32> to vector<16x32xf32>
    %94 = arith.mulf %92, %93 : vector<16x32xf32>
    %95 = vector.broadcast %4 : vector<1x32xf32> to vector<16x32xf32>
    %96 = arith.addf %94, %95 : vector<16x32xf32>
    %97 = arith.truncf %96 : vector<16x32xf32> to vector<16x32xbf16>
    %c0_40 = arith.constant 0 : index
    %c0_41 = arith.constant 0 : index
    %98 = vector.load %arg4[%c0_40, %c0_41] : memref<32x64xbf16, #tpu.memory_space<vmem>>, vector<32x64xbf16>
    %cst_42 = arith.constant dense<0.000000e+00> : vector<16x64xf32>
    %99 = tpu.matmul %97, %98, %cst_42 {dimension_numbers = #tpu.dot_dimension_numbers<[1], [0], [0], [1], [0, 0, 1, 1], [], []>} : vector<16x32xbf16>, vector<32x64xbf16>, vector<16x64xf32> -> vector<16x64xf32>
    %100 = vector.broadcast %5 : vector<1x64xf32> to vector<16x64xf32>
    %101 = arith.addf %99, %100 : vector<16x64xf32>
    %cst_43 = arith.constant 5.000000e-01 : f32
    %102 = vector.broadcast %cst_43 : f32 to vector<16x64xf32>
    %103 = arith.mulf %102, %101 : vector<16x64xf32>
    %cst_44 = arith.constant 4.471500e-02 : f32
    %104 = vector.broadcast %cst_44 : f32 to vector<16x64xf32>
    %105 = arith.mulf %104, %101 : vector<16x64xf32>
    %106 = arith.mulf %105, %101 : vector<16x64xf32>
    %107 = arith.mulf %106, %101 : vector<16x64xf32>
    %108 = arith.addf %101, %107 : vector<16x64xf32>
    %cst_45 = arith.constant 0.797884583 : f32
    %109 = vector.broadcast %cst_45 : f32 to vector<16x64xf32>
    %110 = arith.mulf %109, %108 : vector<16x64xf32>
    %111 = math.tanh %110 : vector<16x64xf32>
    %cst_46 = arith.constant 1.000000e+00 : f32
    %112 = vector.broadcast %cst_46 : f32 to vector<16x64xf32>
    %113 = arith.addf %112, %111 : vector<16x64xf32>
    %114 = arith.mulf %103, %113 : vector<16x64xf32>
    %115 = arith.truncf %114 : vector<16x64xf32> to vector<16x64xbf16>
    %c0_47 = arith.constant 0 : index
    %c0_48 = arith.constant 0 : index
    %116 = vector.load %arg5[%c0_47, %c0_48] : memref<64x32xbf16, #tpu.memory_space<vmem>>, vector<64x32xbf16>
    %cst_49 = arith.constant dense<0.000000e+00> : vector<16x32xf32>
    %117 = tpu.matmul %115, %116, %cst_49 {dimension_numbers = #tpu.dot_dimension_numbers<[1], [0], [0], [1], [0, 0, 1, 1], [], []>} : vector<16x64xbf16>, vector<64x32xbf16>, vector<16x32xf32> -> vector<16x32xf32>
    %118 = vector.broadcast %6 : vector<1x32xf32> to vector<16x32xf32>
    %119 = arith.addf %117, %118 : vector<16x32xf32>
    %120 = arith.addf %74, %119 : vector<16x32xf32>
    %c0_50 = arith.constant 0 : index
    %c0_51 = arith.constant 0 : index
    %121 = vector.load %arg8[%c0_50, %c0_51] : memref<16x32xf32, #tpu.memory_space<vmem>>, vector<16x32xf32>
    tpu.vector_store %arg8[%c0_50, %c0_51], %120 {strides = array<i32>} : memref<16x32xf32, #tpu.memory_space<vmem>>, vector<16x32xf32>,
    return
  }
}

</mosaic_0001>

<bundles_post_ra>
// kernel: msingi_block.1
= control target key start
LH: loop header
LB: loop body
LE: loop exit
PB: predicated region body
PF: predicated region fallthrough
CT: control target
= control target key end

     0   :  { %13 = vsyncpa [#allocation3], 0  ;;  %s1571_s0 = inlined_call_operand.vmem [shape: f32[16,32], index: 0, kind: input, shape index: {}, may-alias: {0,8}]   ;;  %s1572_s1 = inlined_call_operand.vmem [shape: bf16[32,96], index: 1, kind: input, shape index: {}]   ;;  %s1573_s2 = inlined_call_operand.vmem [shape: bf16[32,64], index: 2, kind: input, shape index: {}]   ;;  %s1574_s3 = inlined_call_operand.hbm [shape: bf16[32,32], index: 3, kind: input, shape index: {}]   ;;  %s1575_s4 = inlined_call_operand.hbm [shape: bf16[32,64], index: 4, kind: input, shape index: {}]   ;;  %s1576_s5 = inlined_call_operand.vmem [shape: bf16[64,32], index: 5, kind: input, shape index: {}]   ;;  %s1577_s6 = inlined_call_operand.vmem [shape: bf16[64,48], index: 6, kind: input, shape index: {}]   ;;  %s1578_s7 = inlined_call_operand.vmem [shape: f32[56,64], index: 7, kind: input, shape index: {}]   ;;  %s1579_s8 = inlined_call_operand.vmem [shape: f32[16,32], index: 8, kind: output, shape index: {}, may-alias: {0,8}]  }
   0x1   :  { %14 = vsyncpa [#allocation5], 0  ;;  %s1228_s27 = smov [#allocation2]   ;;  %s1180_s9 = scalar_lea.hbm %s1574_s3, 256 }
   0x2   :  { %s26_s28 = sshll.u32 %s1228_s27, 4  ;;  %p1181_p0 = scmp.ne.s32.totalorder %s1574_s3, %s1180_s9  ;;  %s27_s28 = int_to_ptr.vmem [resolvable:$true] %s26_s28 }
   0x3   :  { %p1184_p1 = scmp.lt.u32.totalorder %s1180_s9, %s1574_s3 }
   0x5   :  { %p1186_p2 = pnand %p1184_p1, %p1181_p0 }
   0x7   :  { %1189 = shalt.err (!%p1186_p2)
}
   0x8   :  { %s1190_s14 = scalar_lea.vmem %s27_s28, 256  ;;  %p1195_p4 = scmp.lt.s32.totalorder %s27_s28, %s27_s28 }
   0x9   :  { %p1191_p3 = scmp.ne.s32.totalorder %s27_s28, %s1190_s14  ;;  %p1196_p5 = scmp.lt.s32.totalorder %s1190_s14, %s1190_s14 }
   0xb   :  { %p1197_p6 = por %p1196_p5, %p1195_p4 }
   0xd   :  { %p1198_p7 = pnand %p1197_p6, %p1191_p3 }
   0xf   :  { %1201 = shalt.err (!%p1198_p7)
}
  0x10   :  { %s1229_s15 = smov 64   ;;  %s1230_s16 = smov 4  }
  0x11   :  { %32 = dma.hbm_to_vmem [thread:$0]  %s1574_s3, 256, %s27_s28, [#allocation3], %s1229_s15, %s1229_s15, %s1230_s16  }
  0x12   :  { %s1231_s19 = smov [#allocation4]   ;;  %s1202_s23 = scalar_lea.hbm %s1575_s4, 256 }
  0x13   :  { %s38_s20 = sshll.u32 %s1231_s19, 4  ;;  %p1203_p8 = scmp.ne.s32.totalorder %s1575_s4, %s1202_s23  ;;  %s39_s20 = int_to_ptr.vmem [resolvable:$true] %s38_s20 }
  0x14   :  { %p1206_p9 = scmp.lt.u32.totalorder %s1202_s23, %s1575_s4 }
  0x16   :  { %p1208_p10 = pnand %p1206_p9, %p1203_p8 }
  0x18   :  { %1211 = shalt.err (!%p1208_p10)
}
  0x19   :  { %s1212_s29 = scalar_lea.vmem %s39_s20, 256  ;;  %p1217_p12 = scmp.lt.s32.totalorder %s39_s20, %s39_s20 }
  0x1a   :  { %p1213_p11 = scmp.ne.s32.totalorder %s39_s20, %s1212_s29  ;;  %p1218_p13 = scmp.lt.s32.totalorder %s1212_s29, %s1212_s29 }
  0x1c   :  { %p1219_p0 = por %p1218_p13, %p1217_p12 }
  0x1e   :  { %p1220_p1 = pnand %p1219_p0, %p1213_p11 }
  0x20   :  { %1223 = shalt.err (!%p1220_p1)
}
  0x21   :  { %44 = dma.hbm_to_vmem [thread:$0]  %s1575_s4, 256, %s39_s20, [#allocation5], %s1229_s15, %s1229_s15, %s1230_s16  }
  0x22   :  { %1224 = dma.done.wait [#allocation3], 256  }
  0x23   :  { %1225 = vsyncadd [#allocation3], 4294967040 }
  0x24   :  { %1226 = dma.done.wait [#allocation5], 256  }
  0x25   :  { %1227 = vsyncadd [#allocation5], 4294967040  ;;  %vm88_vm0 = vcmask 261120   ;;  %v1312_v0 = vld [vmem:[%s1571_s0] sm:$0xff]  ;;  %v1317_v1 = vld [vmem:[%s1571_s0 + $0x8] sm:$0xff]  ;;  %v1232_v15 = vmov 0.0  }
  0x26   :  { %v89_v2 = vsel %vm88_vm0, %v1312_v0, 0.0  ;;  %v92_v3 = vsel %vm88_vm0, %v1317_v1, 0.0  ;;  %v1140_v14 = vld [vmem:[%s1572_s1] sm:$0xff]   ;;  %1012 = vmatprep.subr.bf16.mxu1 %v1232_v15  ;;  %v1141_v16 = vld [vmem:[%s1572_s1 + $0x8] sm:$0xff]   ;;  %vm1233_vm1 = vmmov 0   ;;  %s1234_s1 = smov 112  }
  0x27   :  { %90 = vadd.xlane.f32.xlu0 %v89_v2  ;;  %1013 = vmatpush3.bf16.msra.mxu1 %v1140_v14  ;;  %v1341_v17 = vld [vmem:[%s1577_s6] sm:$0xff]   ;;  %v1346_v18 = vld [vmem:[%s1577_s6 + $0x8] sm:$0xff]   ;;  %v1374_v44 = vld [vmem:[%s1577_s6 + $0x10] sm:$0xff]   ;;  %vm281_vm2 = vcmask 130048   ;;  %s1235_s12 = smov 96   ;;  %vm536_vm3 = vcmask 523264  }
  0x28   :  { %1016 = vmatprep.mubr.msk.bf16.mxu1 %vm1233_vm1, %v1232_v15  ;;  %1014 = vmatprep.subr.bf16.mxu1 %v1232_v15  ;;  %v80_v19 = vunpack.c.l.bf16 %v1341_v17  ;;  %v81_v20 = vunpack.c.h.bf16 %v1341_v17  ;;  %v82_v21 = vunpack.c.l.bf16 %v1346_v18  ;;  %v83_v22 = vunpack.c.h.bf16 %v1346_v18  ;;  %v932_v33 = vld [vmem:[%s1578_s7] ss:$0 sm:$0xff]  ;;  %v933_v37 = vld [vmem:[%s1578_s7 + $0x1] ss:$0 sm:$0xff]  ;;  %v1143_v43 = vld [vmem:[%s1573_s2 + $0x8] sm:$0xff]  }
  0x29   :  { %v1142_v41 = vld [vmem:[%s1573_s2] sm:$0xff]   ;;  %v84_v45 = vunpack.c.l.bf16 %v1374_v44  ;;  %v85_v46 = vunpack.c.h.bf16 %v1374_v44  ;;  %v68_v53 = vld [vmem:[%s1578_s7 + $0x18] sm:$0xff]  ;;  %v70_v54 = vld [vmem:[%s1578_s7 + $0x28] sm:$0xff]  ;;  %1030 = vmatprep.mubr.msk.bf16.mxu0 %vm281_vm2, %v1341_v17 }
  0x2a   :  { %v1120_v23 = vpack.i.bf16 %v81_v20, %v80_v19  ;;  %v1125_v24 = vpack.i.bf16 %v83_v22, %v82_v21  ;;  %v69_v55 = vld [vmem:[%s1578_s7 + $0x20] sm:$0xff]  ;;  %v71_v57 = vld [vmem:[%s1578_s7 + $0x30] sm:$0xff] }
  0x2b   :  { %93 = vadd.xlane.f32.xlu0 %v92_v3  ;;  %1015 = vmatpush3.bf16.msra.mxu1 %v1141_v16  ;;  %v1130_v47 = vpack.i.bf16 %v85_v46, %v84_v45 }
  0x2c   :  { %1020 = vmatprep.subr.bf16.mxu1 %v1232_v15 }
  0xb4   :  { %v91_v4 = vpop.xlane.xlu0 %90 }
  0xb5   :  { %v96_v5 = vmul.f32 0.03125, %v91_v4 }
  0xb7   :  { %v98_v6 = vsub.f32 %v1312_v0, %v96_v5 }
  0xb8   :  { %v94_v7 = vpop.xlane.xlu0 %93 }
  0xb9   :  { %v97_v8 = vmul.f32 0.03125, %v94_v7  ;;  %v100_v9 = vmul.f32 %v98_v6, %v98_v6 }
  0xbb   :  { %v99_v10 = vsub.f32 %v1317_v1, %v97_v8  ;;  %v102_v11 = vsel %vm88_vm0, %v100_v9, 0.0  ;;  %v1405_v8 = vld [vmem:[%s1577_s6 + $0x18] sm:$0xff]  }
  0xbc   :  { %103 = vadd.xlane.f32.xlu1 %v102_v11  ;;  %v86_v9 = vunpack.c.l.bf16 %v1405_v8 }
  0xbd   :  { %v101_v12 = vmul.f32 %v99_v10, %v99_v10 }
  0xbf   :  { %v105_v13 = vsel %vm88_vm0, %v101_v12, 0.0 }
  0xc0   :  { %106 = vadd.xlane.f32.xlu1 %v105_v13 }
  0xd1   :  { %1121 = vrot.lane.b32.xlu1 %v1120_v23, %s1234_s1 }
  0xd5   :  { %1126 = vrot.lane.b32.xlu1 %v1125_v24, %s1234_s1 }
  0xd9   :  { %1131 = vrot.lane.b32.xlu1 %v1130_v47, %s1234_s1 }
 0x149   :  { %v104_v25 = vpop.xlane.xlu1 %103 }
 0x14a   :  { %v108_v26 = vmul.f32 0.03125, %v104_v25 }
 0x14c   :  { %v110_v27 = vadd.f32 1e-05, %v108_v26 }
 0x14d   :  { %v107_v28 = vpop.xlane.xlu1 %106 }
 0x14e   :  { %1160 = vrsqrt.f32 %v110_v27  ;;  %v109_v29 = vmul.f32 0.03125, %v107_v28 }
 0x150   :  { %v111_v30 = vadd.f32 1e-05, %v109_v29 }
 0x151   :  { %v1122_v13 = vpop.permute.xlu1 %1121 }
 0x152   :  { %1162 = vrsqrt.f32 %v111_v30  ;;  %v1124_v21 = vunpack.i.h.bf16 %v1122_v13  ;;  %v1123_v22 = vunpack.i.l.bf16 %v1122_v13 }
 0x155   :  { %v1127_v14 = vpop.permute.xlu1 %1126 }
 0x156   :  { %v1129_v24 = vunpack.i.h.bf16 %v1127_v14 }
 0x158   :  { %v1161_v31 = vpop.eup %1160 }
 0x159   :  { %v114_v32 = vmul.f32 %v1161_v31, %v98_v6  ;;  %v1414_v16 = vpop.permute.xlu1 %1131 }
 0x15b   :  { %v120_v36 = vmul.f32 %v932_v33, %v114_v32 }
 0x15c   :  { %v1163_v34 = vpop.eup %1162 }
 0x15d   :  { %v115_v35 = vmul.f32 %v1163_v34, %v99_v10  ;;  %v126_v39 = vadd.f32 %v933_v37, %v120_v36  ;;  %v87_v10 = vunpack.c.h.bf16 %v1405_v8 }
 0x15f   :  { %v121_v38 = vmul.f32 %v932_v33, %v115_v35  ;;  %v1135_v12 = vpack.i.bf16 %v87_v10, %v86_v9  ;;  %v1133_v35 = vunpack.i.l.bf16 %v1414_v16 }
 0x161   :  { %v127_v40 = vadd.f32 %v933_v37, %v121_v38 }
 0x163   :  { %v128_v42 = vpack.c.bf16 %v127_v40, %v126_v39  ;;  %v1134_v40 = vunpack.i.h.bf16 %v1414_v16 }
 0x165   :  { %1017 = vmatmul.mubr.msk.bf16.vlgmr.msra.gmra.mrb[0].mxu1 %vm88_vm0, %v128_v42 }
 0x166   :  { %1021 = vmatpush3.bf16.msra.mxu1 %v1142_v41  ;;  %1024 = vmatprep.mubr.msk.bf16.mxu1 %vm1233_vm1, %v1232_v15 }
 0x167   :  { %1022 = vmatprep.subr.bf16.mxu1 %v1232_v15 }
 0x16a   :  { %1023 = vmatpush3.bf16.msra.mxu1 %v1143_v43 }
 0x16d   :  { %1025 = vmatmul.mubr.msk.bf16.vlgmr.msra.gmra.mrb[4].mxu1 %vm88_vm0, %v128_v42 }
 0x16e   :  { %1040 = vmatprep.mubr.msk.bf16.mxu1 %vm281_vm2, %v1341_v17 }
 0x238   :  { %v182_v48 = vpop.f32.mrb[0].mxu1 }
 0x239   :  { %v1018_v49 = vpop.f32.mrb[1].mxu1  ;;  %v246_v58 = vmul.f32 %v182_v48, %v68_v53 }
 0x23a   :  { %v185_v50 = vpop.f32.mrb[2].mxu1 }
 0x23b   :  { %v1019_v51 = vpop.f32.mrb[3].mxu1  ;;  %v256_v52 = vpack.c.bf16 %v185_v50, %v182_v48  ;;  %v247_v62 = vmul.f32 %v185_v50, %v69_v55 }
 0x23d   :  { %400 = vrot.lane.b32.xlu1 %v256_v52, %s1229_s15 }
 0x240   :  { %v239_v56 = vpop.f32.mrb[4].mxu1 }
 0x241   :  { %v248_v59 = vmul.f32 %v239_v56, %v70_v54  ;;  %v1026_v60 = vpop.f32.mrb[5].mxu1  ;;  %552 = vrot.lane.b32.xlu1 %v1346_v18, %s1234_s1 }
 0x242   :  { %v242_v61 = vpop.f32.mrb[6].mxu1 }
 0x243   :  { %v250_v63 = vadd.f32 %v248_v59, %v246_v58  ;;  %v249_v2 = vmul.f32 %v242_v61, %v71_v57  ;;  %v1027_v3 = vpop.f32.mrb[7].mxu1 }
 0x245   :  { %v251_v4 = vadd.f32 %v249_v2, %v247_v62  ;;  %v1398_v5 = vmul.f32 0.35355338, %v250_v63 }
 0x247   :  { %v1400_v6 = vmul.f32 0.35355338, %v251_v4  ;;  %v255_v7 = vpack.c.bf16 %v251_v4, %v250_v63 }
 0x249   :  { %v254_v11 = vpack.c.bf16 %v1400_v6, %v1398_v5  ;;  %278 = vrot.lane.b32.xlu0 %v255_v7, %s1235_s12  ;;  %v67_v5 = vld [vmem:[%s1578_s7 + $0x10] sm:$0xff] }
 0x24d   :  { %1136 = vrot.lane.b32.xlu0 %v1135_v12, %s1234_s1 }
 0x251   :  { %550 = vrot.lane.b32.xlu0 %v1341_v17, %s1234_s1  ;;  %v1128_v17 = vunpack.i.l.bf16 %v1127_v14 }
 0x2af   :  { %v401_v19 = vpop.permute.xlu1 %400 }
 0x2b0   :  { %1038 = vmatprep.subr.bf16.mxu1 %v401_v19 }
 0x2b1   :  { %1039 = vmatpush3.bf16.msra.mxu1 %v401_v19 }
 0x2b2   :  { %1060 = vmatprep.subr.bf16.mxu1 %v1232_v15 }
 0x2b3   :  { %v553_v19 = vpop.permute.xlu1 %552 }
 0x2b4   :  { %1041 = vmatmul.mubr.msk.bf16.vlgmr.msra.gmra.mrb[8].mxu1 %vm281_vm2, %v1346_v18 }
 0x2b5   :  { %1044 = vmatprep.mubr.msk.bf16.mxu1 %vm281_vm2, %v1374_v44 }
 0x2bb   :  { %v279_v20 = vpop.permute.xlu0 %278 }
 0x2bc   :  { %1028 = vmatprep.subr.bf16.mxu0 %v279_v20  ;;  %1045 = vmatmul.mubr.msk.bf16.gmra.mrb[12].mxu1 %vm281_vm2, %v1405_v8 }
 0x2bd   :  { %1029 = vmatpush3.bf16.msra.mxu0 %v279_v20  ;;  %1068 = vmatprep.mubr.msk.bf16.mxu1 %vm1233_vm1, %v1232_v15  ;;  %v66_v20 = vld [vmem:[%s1578_s7 + $0x8] sm:$0xff] }
 0x2be   :  { %1048 = vmatprep.subr.bf16.mxu0 %v1232_v15 }
 0x2bf   :  { %v1137_v31 = vpop.permute.xlu0 %1136 }
 0x2c0   :  { %1031 = vmatmul.mubr.msk.bf16.vlgmr.msra.gmra.mrb[0].mxu0 %vm281_vm2, %v1346_v18  ;;  %v1138_v34 = vunpack.i.l.bf16 %v1137_v31  ;;  %v1139_v37 = vunpack.i.h.bf16 %v1137_v31 }
 0x2c1   :  { %1034 = vmatprep.mubr.msk.bf16.mxu0 %vm281_vm2, %v1374_v44 }
 0x2c3   :  { %v551_v16 = vpop.permute.xlu0 %550 }
 0x2c4   :  { %1061 = vmatpush3.bf16.msra.mxu1 %v551_v16 }
 0x2c5   :  { %1062 = vmatprep.subr.bf16.mxu1 %v1232_v15 }
 0x2c8   :  { %1035 = vmatmul.mubr.msk.bf16.gmra.mrb[4].mxu0 %vm281_vm2, %v1405_v8  ;;  %1063 = vmatpush3.bf16.msra.mxu1 %v553_v19 }
 0x2c9   :  { %1056 = vmatprep.mubr.msk.bf16.mxu0 %vm1233_vm1, %v1232_v15  ;;  %1064 = vmatprep.subr.bf16.mxu1 %v1232_v15 }
 0x387   :  { %v1042_v23 = vpop.f32.mrb[8].mxu1 }
 0x388   :  { %v1434_v25 = vmul.f32 %v1128_v17, %v1042_v23  ;;  %v437_v26 = vpop.f32.mrb[9].mxu1 }
 0x389   :  { %v1436_v27 = vmul.f32 %v1123_v22, %v437_v26  ;;  %v1043_v18 = vpop.f32.mrb[10].mxu1 }
 0x38a   :  { %v1438_v28 = vmul.f32 %v1129_v24, %v1043_v18  ;;  %v440_v29 = vpop.f32.mrb[11].mxu1 }
 0x38b   :  { %v1440_v30 = vmul.f32 %v1124_v21, %v440_v29 }
 0x38c   :  { %v609_v32 = vpack.c.bf16 %v1438_v28, %v1434_v25  ;;  %v1149_v25 = vld [vmem:[#allocation2 + $0x8] sm:$0xff]  }
 0x38d   :  { %v608_v33 = vpack.c.bf16 %v1440_v30, %v1436_v27 }
 0x38f   :  { %v1046_v36 = vpop.f32.mrb[12].mxu1 }
 0x390   :  { %v1447_v38 = vmul.f32 %v1138_v34, %v1046_v36  ;;  %v453_v39 = vpop.f32.mrb[13].mxu1 }
 0x391   :  { %v1450_v41 = vmul.f32 %v1133_v35, %v453_v39  ;;  %v1047_v42 = vpop.f32.mrb[14].mxu1 }
 0x392   :  { %v1452_v43 = vmul.f32 %v1139_v37, %v1047_v42  ;;  %v456_v45 = vpop.f32.mrb[15].mxu1 }
 0x393   :  { %v1032_v46 = vpop.f32.mrb[0].mxu0  ;;  %v1454_v47 = vmul.f32 %v1134_v40, %v456_v45 }
 0x394   :  { %v328_v48 = vpop.f32.mrb[1].mxu0  ;;  %v611_v49 = vpack.c.bf16 %v1452_v43, %v1447_v38  ;;  %v393_v53 = vmul.f32 %v1128_v17, %v1032_v46 }
 0x395   :  { %v391_v50 = vmul.f32 %v1123_v22, %v328_v48  ;;  %v1033_v51 = vpop.f32.mrb[2].mxu0  ;;  %v610_v52 = vpack.c.bf16 %v1454_v47, %v1450_v41 }
 0x396   :  { %v394_v54 = vmul.f32 %v1129_v24, %v1033_v51  ;;  %v331_v55 = vpop.f32.mrb[3].mxu0 }
 0x397   :  { %v392_v56 = vmul.f32 %v1124_v21, %v331_v55 }
 0x398   :  { %v477_v57 = vpack.c.bf16 %v394_v54, %v393_v53 }
 0x399   :  { %v476_v58 = vpack.c.bf16 %v392_v56, %v391_v50 }
 0x39a   :  { %v487_v12 = vsel %vm88_vm0, %v477_v57, 0 }
 0x39b   :  { %v484_v59 = vsel %vm88_vm0, %v476_v58, 0  ;;  %v1036_v60 = vpop.f32.mrb[4].mxu0 }
 0x39c   :  { %1049 = vmatpush3.bf16.xpose.msra.mxu0 %v484_v59  ;;  %v344_v61 = vpop.f32.mrb[5].mxu0  ;;  %v397_v62 = vmul.f32 %v1138_v34, %v1036_v60 }
 0x39d   :  { %v395_v63 = vmul.f32 %v1133_v35, %v344_v61  ;;  %v1037_v2 = vpop.f32.mrb[6].mxu0  ;;  %1050 = vmatprep.subr.bf16.mxu0 %v1232_v15 }
 0x39e   :  { %v398_v3 = vmul.f32 %v1139_v37, %v1037_v2  ;;  %v347_v4 = vpop.f32.mrb[7].mxu0 }
 0x39f   :  { %v396_v7 = vmul.f32 %v1134_v40, %v347_v4 }
 0x3a0   :  { %v479_v9 = vpack.c.bf16 %v398_v3, %v397_v62 }
 0x3a1   :  { %v478_v10 = vpack.c.bf16 %v396_v7, %v395_v63 }
 0x3a2   :  { %v493_v14 = vsel %vm88_vm0, %v479_v9, 0  ;;  %v1150_v9 = vld [vmem:[#allocation4] sm:$0xff]  }
 0x3a3   :  { %v490_v13 = vsel %vm88_vm0, %v478_v10, 0  ;;  %v1151_v10 = vld [vmem:[#allocation4 + $0x8] sm:$0xff]  }
 0x3a4   :  { %1051 = vmatpush3.bf16.xpose.msra.mxu0 %v487_v12 }
 0x3a5   :  { %1052 = vmatprep.subr.bf16.mxu0 %v1232_v15 }
 0x3ac   :  { %1053 = vmatpush3.bf16.xpose.msra.mxu0 %v490_v13 }
 0x3ad   :  { %1054 = vmatprep.subr.bf16.mxu0 %v1232_v15 }
 0x3b4   :  { %1055 = vmatpush3.bf16.xpose.msra.mxu0 %v493_v14 }
 0x3b5   :  { %1084 = vmatprep.subr.bf16.mxu0 %v1232_v15 }
 0x3bb   :  { %1057 = vmatmul.mubr.msk.bf16.vlgmr.msra.gmra.mrb[8].mxu0 %vm88_vm0, %v254_v11 }
 0x3bc   :  { %1088 = vmatprep.mubr.msk.bf16.mxu0 %vm1233_vm1, %v1232_v15 }
 0x48e   :  { %v529_v17 = vpop.f32.mrb[8].mxu0 }
 0x48f   :  { %v530_v6 = vadd.f32 %v529_v17, %v66_v20  ;;  %v1058_v11 = vpop.f32.mrb[9].mxu0 }
 0x490   :  { %v532_v21 = vpop.f32.mrb[10].mxu0 }
 0x491   :  { %v533_v22 = vadd.f32 %v532_v21, %v67_v5  ;;  %v1059_v23 = vpop.f32.mrb[11].mxu0  ;;  %v537_v24 = vsel %vm536_vm3, %v530_v6, -inf }
 0x492   :  { %538 = vmax.xlane.f32.xlu0 %v537_v24  ;;  %v959_v23 = vld [vmem:[%s1578_s7 + $0x3] ss:$0 sm:$0xff] }
 0x493   :  { %v540_v26 = vsel %vm536_vm3, %v533_v22, -inf }
 0x494   :  { %541 = vmax.xlane.f32.xlu1 %v540_v26 }
 0x4a5   :  { %556 = vrot.lane.b32.xlu1 %v1405_v8, %s1234_s1 }
 0x4a8   :  { %554 = vrot.lane.b32.xlu0 %v1374_v44, %s1234_s1  ;;  %v1148_v44 = vld [vmem:[#allocation2] sm:$0xff]  }
 0x4a9   :  { %1085 = vmatpush3.bf16.msra.mxu0 %v1148_v44 }
 0x4aa   :  { %1086 = vmatprep.subr.bf16.mxu0 %v1232_v15 }
 0x4ad   :  { %1087 = vmatpush3.bf16.msra.mxu0 %v1149_v25 }
 0x4ae   :  { %1100 = vmatprep.subr.bf16.mxu0 %v1232_v15 }
 0x51f   :  { %v539_v18 = vpop.xlane.xlu0 %538 }
 0x520   :  { %v543_v29 = vsub.f32 %v530_v6, %v539_v18  ;;  %v958_v6 = vld [vmem:[%s1578_s7 + $0x2] ss:$0 sm:$0xff] }
 0x521   :  { %v542_v31 = vpop.xlane.xlu1 %541 }
 0x522   :  { %v545_v34 = vmul.f32 1.442695, %v543_v29  ;;  %v544_v35 = vsub.f32 %v533_v22, %v542_v31  ;;  %v1152_v31 = vld [vmem:[%s1576_s5] sm:$0xff]  }
 0x523   :  { %v555_v36 = vpop.permute.xlu0 %554 }
 0x524   :  { %v547_v37 = vmul.f32 1.442695, %v544_v35  ;;  %1065 = vmatpush3.bf16.msra.mxu1 %v555_v36  ;;  %1164 = vpow2.f32 %v545_v34  ;;  %v1153_v34 = vld [vmem:[%s1576_s5 + $0x8] sm:$0xff]   ;;  %v1154_v35 = vld [vmem:[%s1576_s5 + $0x10] sm:$0xff]   ;;  %v1155_v36 = vld [vmem:[%s1576_s5 + $0x18] sm:$0xff]  }
 0x525   :  { %1066 = vmatprep.subr.bf16.mxu1 %v1232_v15  ;;  %v557_v39 = vpop.permute.xlu1 %556 }
 0x526   :  { %1166 = vpow2.f32 %v547_v37  ;;  %v960_v37 = vld [vmem:[%s1578_s7 + $0x4] ss:$0 sm:$0xff] }
 0x528   :  { %1067 = vmatpush3.bf16.msra.mxu1 %v557_v39 }
 0x529   :  { %1072 = vmatprep.subr.bf16.mxu1 %v1232_v15 }
 0x52e   :  { %v1165_v8 = vpop.eup %1164 }
 0x530   :  { %v1167_v40 = vpop.eup %1166 }
 0x531   :  { %v549_v42 = vpack.c.bf16 %v1167_v40, %v1165_v8 }
 0x533   :  { %1069 = vmatmul.mubr.msk.bf16.vlgmr.msra.gmra.mrb[16].mxu1 %vm536_vm3, %v549_v42 }
 0x534   :  { %1073 = vmatpush3.bf16.msra.mxu1 %v608_v33  ;;  %1080 = vmatprep.mubr.msk.bf16.mxu1 %vm1233_vm1, %v1232_v15 }
 0x535   :  { %1074 = vmatprep.subr.bf16.mxu1 %v1232_v15 }
 0x538   :  { %1075 = vmatpush3.bf16.msra.mxu1 %v609_v32 }
 0x539   :  { %1076 = vmatprep.subr.bf16.mxu1 %v1232_v15 }
 0x53c   :  { %1077 = vmatpush3.bf16.msra.mxu1 %v610_v52 }
 0x53d   :  { %1078 = vmatprep.subr.bf16.mxu1 %v1232_v15 }
 0x540   :  { %1079 = vmatpush3.bf16.msra.mxu1 %v611_v49 }
 0x541   :  { %1092 = vmatprep.subr.bf16.mxu1 %v1232_v15 }
 0x543   :  { %1081 = vmatmul.mubr.msk.bf16.vlgmr.msra.gmra.mrb[20].mxu1 %vm536_vm3, %v549_v42 }
 0x544   :  { %1096 = vmatprep.mubr.msk.bf16.mxu1 %vm1233_vm1, %v1232_v15  ;;  %1093 = vmatpush3.bf16.msra.mxu1 %v1150_v9 }
 0x545   :  { %1094 = vmatprep.subr.bf16.mxu1 %v1232_v15 }
 0x548   :  { %1095 = vmatpush3.bf16.msra.mxu1 %v1151_v10 }
 0x606   :  { %v599_v27 = vpop.f32.mrb[16].mxu1 }
 0x607   :  { %v1070_v28 = vpop.f32.mrb[17].mxu1  ;;  %v606_v30 = vmax.f32 %v599_v27, 1e-30 }
 0x608   :  { %v602_v32 = vpop.f32.mrb[18].mxu1 }
 0x609   :  { %v1071_v33 = vpop.f32.mrb[19].mxu1  ;;  %v607_v38 = vmax.f32 %v602_v32, 1e-30  ;;  %1168 = vrcp.f32 %v606_v30 }
 0x60b   :  { %1170 = vrcp.f32 %v607_v38 }
 0x613   :  { %v1169_v41 = vpop.eup %1168 }
 0x615   :  { %v1171_v47 = vpop.eup %1170 }
 0x616   :  { %v646_v43 = vpop.f32.mrb[20].mxu1 }
 0x617   :  { %v654_v45 = vmul.f32 %v1169_v41, %v646_v43  ;;  %v1082_v46 = vpop.f32.mrb[21].mxu1 }
 0x618   :  { %v649_v48 = vpop.f32.mrb[22].mxu1 }
 0x619   :  { %v656_v49 = vmul.f32 %v1171_v47, %v649_v48  ;;  %v1083_v50 = vpop.f32.mrb[23].mxu1 }
 0x61b   :  { %v657_v51 = vpack.c.bf16 %v656_v49, %v654_v45 }
 0x61d   :  { %1089 = vmatmul.mubr.msk.bf16.vlgmr.msra.gmra.mrb[12].mxu0 %vm88_vm0, %v657_v51 }
 0x61e   :  { %1108 = vmatprep.mubr.msk.bf16.mxu0 %vm1233_vm1, %v1232_v15  ;;  %1101 = vmatpush3.bf16.msra.mxu0 %v1152_v31 }
 0x61f   :  { %1102 = vmatprep.subr.bf16.mxu0 %v1232_v15 }
 0x622   :  { %1103 = vmatpush3.bf16.msra.mxu0 %v1153_v34 }
 0x623   :  { %1104 = vmatprep.subr.bf16.mxu0 %v1232_v15 }
 0x626   :  { %1105 = vmatpush3.bf16.msra.mxu0 %v1154_v35 }
 0x627   :  { %1106 = vmatprep.subr.bf16.mxu0 %v1232_v15 }
 0x62a   :  { %1107 = vmatpush3.bf16.msra.mxu0 %v1155_v36 }
 0x6f0   :  { %v711_v52 = vpop.f32.mrb[12].mxu0 }
 0x6f1   :  { %v1518_v53 = vadd.f32 %v711_v52, %v1312_v0  ;;  %v1090_v54 = vpop.f32.mrb[13].mxu0 }
 0x6f2   :  { %v714_v55 = vpop.f32.mrb[14].mxu0 }
 0x6f3   :  { %v1521_v56 = vadd.f32 %v714_v55, %v1317_v1  ;;  %v1091_v57 = vpop.f32.mrb[15].mxu0  ;;  %v720_v58 = vsel %vm88_vm0, %v1518_v53, 0.0 }
 0x6f4   :  { %721 = vadd.xlane.f32.xlu0 %v720_v58  ;;  %v964_v57 = vld [vmem:[%s1578_s7 + $0x5] ss:$0 sm:$0xff] }
 0x6f5   :  { %v723_v59 = vsel %vm88_vm0, %v1521_v56, 0.0 }
 0x6f6   :  { %724 = vadd.xlane.f32.xlu1 %v723_v59 }
 0x781   :  { %v722_v60 = vpop.xlane.xlu0 %721 }
 0x782   :  { %v726_v61 = vmul.f32 0.03125, %v722_v60 }
 0x783   :  { %v725_v62 = vpop.xlane.xlu1 %724 }
 0x784   :  { %v728_v0 = vsub.f32 %v1518_v53, %v726_v61  ;;  %v727_v63 = vmul.f32 0.03125, %v725_v62 }
 0x786   :  { %v729_v2 = vsub.f32 %v1521_v56, %v727_v63  ;;  %v730_v3 = vmul.f32 %v728_v0, %v728_v0 }
 0x788   :  { %v732_v1 = vsel %vm88_vm0, %v730_v3, 0.0  ;;  %v731_v4 = vmul.f32 %v729_v2, %v729_v2 }
 0x789   :  { %733 = vadd.xlane.f32.xlu0 %v732_v1 }
 0x78a   :  { %v735_v7 = vsel %vm88_vm0, %v731_v4, 0.0 }
 0x78d   :  { %736 = vadd.xlane.f32.xlu0 %v735_v7 }
 0x816   :  { %v734_v12 = vpop.xlane.xlu0 %733 }
 0x817   :  { %v738_v13 = vmul.f32 0.03125, %v734_v12 }
 0x819   :  { %v740_v14 = vadd.f32 1e-05, %v738_v13 }
 0x81a   :  { %v737_v16 = vpop.xlane.xlu0 %736 }
 0x81b   :  { %1172 = vrsqrt.f32 %v740_v14  ;;  %v739_v19 = vmul.f32 0.03125, %v737_v16 }
 0x81d   :  { %v741_v20 = vadd.f32 1e-05, %v739_v19 }
 0x81f   :  { %1174 = vrsqrt.f32 %v741_v20 }
 0x825   :  { %v1173_v17 = vpop.eup %1172 }
 0x826   :  { %v744_v5 = vmul.f32 %v1173_v17, %v728_v0 }
 0x828   :  { %v750_v21 = vmul.f32 %v958_v6, %v744_v5 }
 0x829   :  { %v1175_v11 = vpop.eup %1174 }
 0x82a   :  { %v745_v22 = vmul.f32 %v1175_v11, %v729_v2  ;;  %v756_v26 = vadd.f32 %v959_v23, %v750_v21 }
 0x82c   :  { %v751_v24 = vmul.f32 %v958_v6, %v745_v22 }
 0x82e   :  { %v757_v18 = vadd.f32 %v959_v23, %v751_v24 }
 0x830   :  { %v758_v29 = vpack.c.bf16 %v757_v18, %v756_v26 }
 0x832   :  { %1097 = vmatmul.mubr.msk.bf16.vlgmr.msra.gmra.mrb[24].mxu1 %vm88_vm0, %v758_v29 }
 0x905   :  { %v816_v39 = vpop.f32.mrb[24].mxu1 }
 0x906   :  { %v817_v8 = vadd.f32 %v960_v37, %v816_v39  ;;  %v1098_v40 = vpop.f32.mrb[25].mxu1 }
 0x907   :  { %v819_v42 = vpop.f32.mrb[26].mxu1 }
 0x908   :  { %v825_v44 = vmul.f32 0.044715, %v817_v8  ;;  %v820_v25 = vadd.f32 %v960_v37, %v819_v42  ;;  %v1099_v27 = vpop.f32.mrb[27].mxu1  ;;  %v823_v49 = vmul.f32 0.5, %v817_v8 }
 0x90a   :  { %v827_v28 = vmul.f32 %v825_v44, %v817_v8  ;;  %v826_v30 = vmul.f32 0.044715, %v820_v25  ;;  %v824_v50 = vmul.f32 0.5, %v820_v25 }
 0x90c   :  { %v829_v32 = vmul.f32 %v827_v28, %v817_v8  ;;  %v828_v33 = vmul.f32 %v826_v30, %v820_v25 }
 0x90e   :  { %v831_v38 = vadd.f32 %v829_v32, %v817_v8  ;;  %v830_v41 = vmul.f32 %v828_v33, %v820_v25 }
 0x910   :  { %v833_v43 = vmul.f32 0.7978846, %v831_v38  ;;  %v832_v15 = vadd.f32 %v830_v41, %v820_v25 }
 0x912   :  { %1176 = vtanh.f32 %v833_v43  ;;  %v834_v45 = vmul.f32 0.7978846, %v832_v15 }
 0x914   :  { %1178 = vtanh.f32 %v834_v45 }
 0x91c   :  { %v1177_v46 = vpop.eup %1176 }
 0x91d   :  { %v837_v47 = vadd.f32 1.0, %v1177_v46 }
 0x91e   :  { %v1179_v48 = vpop.eup %1178 }
 0x91f   :  { %v838_v51 = vadd.f32 1.0, %v1179_v48  ;;  %v839_v52 = vmul.f32 %v837_v47, %v823_v49 }
 0x921   :  { %v840_v54 = vmul.f32 %v838_v51, %v824_v50 }
 0x923   :  { %v841_v55 = vpack.c.bf16 %v840_v54, %v839_v52 }
 0x925   :  { %1109 = vmatmul.mubr.msk.bf16.vlgmr.msra.gmra.mrb[16].mxu0 %vm536_vm3, %v841_v55 }
 0x9f8   :  { %v915_v58 = vpop.f32.mrb[16].mxu0 }
 0x9f9   :  { %v916_v59 = vadd.f32 %v964_v57, %v915_v58  ;;  %v1110_v60 = vpop.f32.mrb[17].mxu0 }
 0x9fa   :  { %v918_v61 = vpop.f32.mrb[18].mxu0 }
 0x9fb   :  { %v922_v62 = vadd.f32 %v916_v59, %v1518_v53  ;;  %v919_v0 = vadd.f32 %v964_v57, %v918_v61  ;;  %v1111_v63 = vpop.f32.mrb[19].mxu0 }
 0x9fd   :  { %924 = vst.msk [vmem:[%s1579_s8] sm:$0xff] %vm88_vm0, %v922_v62  ;;  %v923_v2 = vadd.f32 %v919_v0, %v1521_v56 }
 0x9ff   :  { %925 = vst.msk [vmem:[%s1579_s8 + $0x8] sm:$0xff] %vm88_vm0, %v923_v2 }
 0xa00   :  { %930 = vsyncpa [#allocation3], 1 }
 0xa01   :  { %931 = vsyncpa [#allocation5], 1 }

</bundles_post_ra>
